<compile_context>
chip_gen: v6e
topology: v6e:2x2x1
jax: 0.10.0
libtpu: 0.0.40
codegen_flags: <defaults>
</compile_context>

<pallas_src>
import jax
import jax.numpy as jnp
from jax.experimental import pallas as pl
from jax.experimental.pallas import tpu as pltpu


def _round_up(x, m):
    return (x + m - 1) // m * m


def _cdiv(a, b):
    return (a + b - 1) // b


def language_model_criterion(inp, target, mask, *, tm=None, tv=None,
                             stream_bf16=False):
    """inp: (B,S,V) log-probs, target: (B,S) int, mask: (B,S) -> scalar f32."""
    B, S, V = inp.shape
    N = B * S

    if stream_bf16 and inp.dtype == jnp.float32:
        # Halves bytes streamed from HBM; result changes only by bf16 rounding
        # of the one gathered log-prob per row.
        inp = inp.astype(jnp.bfloat16)
    itemsize = jnp.dtype(inp.dtype).itemsize

    # ---- tile-size selection -------------------------------------------------
    # vocab tile: multiple of 128 lanes, capped at 2048 (ragged last tile OK).
    if tv is None:
        tv = min(2048, _round_up(V, 128))
    # row tile: ~4 MiB per streamed input buffer (Pallas double-buffers it).
    if tm is None:
        budget_bytes = 4 * 1024 * 1024
        tm = budget_bytes // (tv * itemsize)
        tm = max(16, min(1024, tm))
        tm = min(tm, _round_up(N, 16))
        tm = max(16, (tm // 16) * 16)              # 16: bf16 sublane packing

    n_row_tiles = _cdiv(N, tm)
    n_vocab_tiles = _cdiv(V, tv)
    Np = n_row_tiles * tm

    # ---- flatten; pad ONLY the tiny per-row arrays ---------------------------
    inp2 = inp.reshape(N, V)                       # streamed as-is, never padded
    tgt2 = target.reshape(N, 1).astype(jnp.int32)
    msk2 = mask.reshape(N, 1).astype(jnp.float32)
    if Np != N:
        # target = -1 can never equal a column index, so the garbage rows of
        # the ragged last log-prob block contribute exactly 0 (NaN-safe).
        tgt2 = jnp.pad(tgt2, ((0, Np - N), (0, 0)), constant_values=-1)
        msk2 = jnp.pad(msk2, ((0, Np - N), (0, 0)))

    # ---- kernel --------------------------------------------------------------
    def _lmc_kernel(inp_ref, tgt_ref, msk_ref, out_ref):
        j = pl.program_id(1)                       # vocab-tile index (innermost)

        @pl.when(j == 0)
        def _():
            out_ref[...] = jnp.zeros_like(out_ref)

        x = inp_ref[...]                           # (tm, tv), native dtype
        # Fold the vocab-tile offset into the (tm, 1) target instead of adding
        # j*tv to the full (tm, tv) iota: the big compare stays loop-invariant.
        tgt_local = tgt_ref[...] - j * tv          # (tm, 1) i32
        col = jax.lax.broadcasted_iota(jnp.int32, x.shape, 1)
        sel = jnp.where(col == tgt_local, x, 0)    # OOB vocab cols never match
        # Exact even in bf16: at most one nonzero addend per row.
        gathered = jnp.sum(sel, axis=-1, keepdims=True).astype(jnp.float32)
        out_ref[...] += gathered                   # resident accumulator over j

        @pl.when(j == pl.num_programs(1) - 1)      # once per row tile
        def _():
            out_ref[...] = -out_ref[...] * msk_ref[...]

    partial = pl.pallas_call(
        _lmc_kernel,
        out_shape=jax.ShapeDtypeStruct((Np, 1), jnp.float32),
        grid_spec=pltpu.PrefetchScalarGridSpec(
            num_scalar_prefetch=0,
            grid=(n_row_tiles, n_vocab_tiles),
            in_specs=[
                pl.BlockSpec((tm, tv), lambda i, j: (i, j)),   # log-probs
                pl.BlockSpec((tm, 1), lambda i, j: (i, 0)),    # targets (resident over j)
                pl.BlockSpec((tm, 1), lambda i, j: (i, 0)),    # mask    (resident over j)
            ],
            out_specs=pl.BlockSpec((tm, 1), lambda i, j: (i, 0)),
        ),
        compiler_params=pltpu.CompilerParams(
            dimension_semantics=("parallel", "arbitrary"),     # row tiles independent
            vmem_limit_bytes=48 << 20,
        ),
    )(inp2, tgt2, msk2)

    # Tiny final reductions + divide in plain JAX (padded rows contribute 0).
    return jnp.sum(partial) / jnp.sum(msk2)


def _reference(inp, target, mask):
    B, S, V = inp.shape
    x = inp.reshape(-1, V)
    t = target.reshape(-1, 1).astype(jnp.int32)
    m = mask.reshape(-1, 1).astype(jnp.float32)
    g = jnp.take_along_axis(x, t, axis=1)
    return jnp.sum(-g * m) / jnp.sum(m)


if __name__ == "__main__":
    key = jax.random.PRNGKey(0)
    keys = jax.random.split(key, 9)

    # --- test 1: small f32, single tile (module's nominal usage) --------------
    B, S, V = 2, 8, 32
    logprobs = jax.nn.log_softmax(
        jax.random.normal(keys[0], (B, S, V), dtype=jnp.float32), axis=-1)
    target = jax.random.randint(keys[1], (B, S), 0, V, dtype=jnp.int32)
    mask = (jax.random.uniform(keys[2], (B, S)) > 0.3).astype(jnp.float32)
    mask = mask.at[0, 0].set(1.0)                  # ensure nonzero denominator
    out = jax.block_until_ready(language_model_criterion(logprobs, target, mask))
    ref = _reference(logprobs, target, mask)
    assert jnp.allclose(out, ref, rtol=1e-5, atol=1e-6), (out, ref)

    # --- test 2: non-divisible rows AND vocab (ragged edges + row padding) ----
    B2, S2, V2 = 3, 37, 300                        # N=111 -> 1 padded row
    logprobs2 = jax.nn.log_softmax(
        jax.random.normal(keys[3], (B2, S2, V2), dtype=jnp.float32), axis=-1)
    target2 = jax.random.randint(keys[4], (B2, S2), 0, V2, dtype=jnp.int32)
    mask2 = (jax.random.uniform(keys[5], (B2, S2)) > 0.3).astype(jnp.float32)
    mask2 = mask2.at[0, 0].set(1.0)
    out2 = jax.block_until_ready(
        language_model_criterion(logprobs2, target2, mask2, tm=16, tv=128))
    ref2 = _reference(logprobs2, target2, mask2)
    assert jnp.allclose(out2, ref2, rtol=1e-5, atol=1e-5), (out2, ref2)

    # --- test 3: bf16 streamed natively (no full-tile f32 cast in kernel) -----
    B3, S3, V3 = 2, 24, 500
    lp3 = jax.nn.log_softmax(
        jax.random.normal(keys[6], (B3, S3, V3), dtype=jnp.float32),
        axis=-1).astype(jnp.bfloat16)
    target3 = jax.random.randint(keys[7], (B3, S3), 0, V3, dtype=jnp.int32)
    mask3 = (jax.random.uniform(keys[8], (B3, S3)) > 0.3).astype(jnp.float32)
    mask3 = mask3.at[0, 0].set(1.0)
    out3 = jax.block_until_ready(language_model_criterion(lp3, target3, mask3))
    ref3 = _reference(lp3, target3, mask3)
    assert jnp.allclose(out3, ref3, rtol=1e-3, atol=1e-3), (out3, ref3)

    print("KERNEL_OK")
</pallas_src>

<mosaic_0001>
module attributes {stable_mosaic.version = 11 : i64} {
  func.func @_lmc_kernel(%arg0: i32, %arg1: i32, %arg2: memref<16x128xf32, #tpu.memory_space<vmem>>, %arg3: memref<16x1xi32, #tpu.memory_space<vmem>>, %arg4: memref<16x1xf32, #tpu.memory_space<vmem>>, %arg5: memref<16x1xf32, #tpu.memory_space<vmem>>) attributes {dimension_semantics = [#tpu.dimension_semantics<parallel>, #tpu.dimension_semantics<arbitrary>], iteration_bounds = array<i64: 1, 1>, scalar_prefetch = 0 : i64, scratch_operands = 0 : i64, tpu.core_type = #tpu.core_type<tc>, window_params = [{transform_indices = @transform_0, window_bounds = array<i64: 16, 128>}, {transform_indices = @transform_1, window_bounds = array<i64: 16, 1>}, {transform_indices = @transform_2, window_bounds = array<i64: 16, 1>}, {transform_indices = @transform_3, window_bounds = array<i64: 16, 1>}]} {
    %c0_i32 = arith.constant 0 : i32
    %0 = arith.cmpi eq, %arg1, %c0_i32 : i32
    %1 = arith.extui %0 : i1 to i32
    %c0_i32_0 = arith.constant 0 : i32
    %2 = arith.cmpi ne, %1, %c0_i32_0 : i32
    scf.if %2 {
      %cst_11 = arith.constant 0.000000e+00 : f32
      %22 = vector.broadcast %cst_11 : f32 to vector<16x1xf32>
      %c0_12 = arith.constant 0 : index
      %c0_13 = arith.constant 0 : index
      %23 = vector.load %arg5[%c0_12, %c0_13] : memref<16x1xf32, #tpu.memory_space<vmem>>, vector<16x1xf32>
      tpu.vector_store %arg5[%c0_12, %c0_13], %22 {strides = array<i32>} : memref<16x1xf32, #tpu.memory_space<vmem>>, vector<16x1xf32>,
    } else {
    }
    %c0 = arith.constant 0 : index
    %c0_1 = arith.constant 0 : index
    %3 = vector.load %arg2[%c0, %c0_1] : memref<16x128xf32, #tpu.memory_space<vmem>>, vector<16x128xf32>
    %c0_2 = arith.constant 0 : index
    %c0_3 = arith.constant 0 : index
    %4 = vector.load %arg3[%c0_2, %c0_3] : memref<16x1xi32, #tpu.memory_space<vmem>>, vector<16x1xi32>
    %c128_i32 = arith.constant 128 : i32
    %5 = arith.muli %arg1, %c128_i32 : i32
    %6 = vector.broadcast %5 : i32 to vector<16x1xi32>
    %7 = arith.subi %4, %6 : vector<16x1xi32>
    %8 = tpu.iota {dimensions = array<i32: 1>} : vector<16x128xi32>
    %9 = vector.broadcast %7 : vector<16x1xi32> to vector<16x128xi32>
    %10 = arith.cmpi eq, %8, %9 : vector<16x128xi32>
    %c0_i32_4 = arith.constant 0 : i32
    %11 = arith.sitofp %c0_i32_4 : i32 to f32
    %12 = vector.broadcast %11 : f32 to vector<16x128xf32>
    %13 = arith.select %10, %3, %12 : vector<16x128xi1>, vector<16x128xf32>
    %cst = arith.constant dense<0.000000e+00> : vector<16xf32>
    %14 = vector.multi_reduction <add>, %13, %cst [1] : vector<16x128xf32> to vector<16xf32>
    %15 = vector.shape_cast %14 : vector<16xf32> to vector<16x1xf32>
    %c0_5 = arith.constant 0 : index
    %c0_6 = arith.constant 0 : index
    %16 = vector.load %arg5[%c0_5, %c0_6] : memref<16x1xf32, #tpu.memory_space<vmem>>, vector<16x1xf32>
    %17 = arith.addf %16, %15 : vector<16x1xf32>
    %c0_7 = arith.constant 0 : index
    %c0_8 = arith.constant 0 : index
    %18 = vector.load %arg5[%c0_7, %c0_8] : memref<16x1xf32, #tpu.memory_space<vmem>>, vector<16x1xf32>
    tpu.vector_store %arg5[%c0_7, %c0_8], %17 {strides = array<i32>} : memref<16x1xf32, #tpu.memory_space<vmem>>, vector<16x1xf32>,
    %c0_i32_9 = arith.constant 0 : i32
    %19 = arith.cmpi eq, %arg1, %c0_i32_9 : i32
    %20 = arith.extui %19 : i1 to i32
    %c0_i32_10 = arith.constant 0 : i32
    %21 = arith.cmpi ne, %20, %c0_i32_10 : i32
    scf.if %21 {
      %c0_11 = arith.constant 0 : index
      %c0_12 = arith.constant 0 : index
      %22 = vector.load %arg5[%c0_11, %c0_12] : memref<16x1xf32, #tpu.memory_space<vmem>>, vector<16x1xf32>
      %cst_13 = arith.constant 0.000000e+00 : f32
      %23 = vector.broadcast %cst_13 : f32 to vector<16x1xf32>
      %24 = arith.subf %23, %22 : vector<16x1xf32>
      %c0_14 = arith.constant 0 : index
      %c0_15 = arith.constant 0 : index
      %25 = vector.load %arg4[%c0_14, %c0_15] : memref<16x1xf32, #tpu.memory_space<vmem>>, vector<16x1xf32>
      %26 = arith.mulf %24, %25 : vector<16x1xf32>
      %c0_16 = arith.constant 0 : index
      %c0_17 = arith.constant 0 : index
      %27 = vector.load %arg5[%c0_16, %c0_17] : memref<16x1xf32, #tpu.memory_space<vmem>>, vector<16x1xf32>
      tpu.vector_store %arg5[%c0_16, %c0_17], %26 {strides = array<i32>} : memref<16x1xf32, #tpu.memory_space<vmem>>, vector<16x1xf32>,
    } else {
    }
    return
  }
  func.func @transform_0(%arg0: i32, %arg1: i32) -> (i32, i32) {
    %c0_i32 = arith.constant 0 : i32
    return %arg0, %arg1 : i32, i32
  }
  func.func @transform_1(%arg0: i32, %arg1: i32) -> (i32, i32) {
    %c0_i32 = arith.constant 0 : i32
    %c0_i32_0 = arith.constant 0 : i32
    return %arg0, %c0_i32 : i32, i32
  }
  func.func @transform_2(%arg0: i32, %arg1: i32) -> (i32, i32) {
    %c0_i32 = arith.constant 0 : i32
    %c0_i32_0 = arith.constant 0 : i32
    return %arg0, %c0_i32 : i32, i32
  }
  func.func @transform_3(%arg0: i32, %arg1: i32) -> (i32, i32) {
    %c0_i32 = arith.constant 0 : i32
    %c0_i32_0 = arith.constant 0 : i32
    return %arg0, %c0_i32 : i32, i32
  }
}

</mosaic_0001>

<bundles_post_ra>
// kernel: tpu_custom_call.1
= control target key start
LH: loop header
LB: loop body
LE: loop exit
PB: predicated region body
PF: predicated region fallthrough
CT: control target
= control target key end

     0   :  { %v72_v0 = vmov 0   ;;  %vm18_vm0 = vcmask 7168   ;;  %v73_v3 = vmov 0.0   ;;  %v29_v4 = vlaneseq  ;;  %s148_s1 = inlined_call_operand.vmem [shape: s32[16,1], index: 1, kind: input, shape index: {}]   ;;  %s149_s3 = inlined_call_operand.vmem [shape: f32[16,1], index: 3, kind: output, shape index: {}]   ;;  %s150_s0 = inlined_call_operand.vmem [shape: f32[16,32], index: 0, kind: input, shape index: {}]   ;;  %s151_s2 = inlined_call_operand.vmem [shape: f32[16,1], index: 2, kind: input, shape index: {}]  }
   0x1   :  { %71 = vset.pattern.permute.xlu0 %v72_v0  ;;  %v23_v1 = vld [vmem:[%s148_s1] sm:$0xff]  ;;  %v24_v2 = vld [vmem:[%s148_s1 + $0x8] sm:$0xff]  ;;  %19 = vst.msk [vmem:[%s149_s3] sm:$0xff] %vm18_vm0, %v73_v3  ;;  %20 = vst.msk [vmem:[%s149_s3 + $0x8] sm:$0xff] %vm18_vm0, %v73_v3 }
   0x2   :  { %32 = vperm.xlu0 %71, %v23_v1   ;;  %v30_v5 = vand.u32 127, %v29_v4  ;;  %v21_v6 = vld [vmem:[%s150_s0] sm:$0xff]  ;;  %v22_v9 = vld [vmem:[%s150_s0 + $0x8] sm:$0xff] }
   0x3   :  { %v59_v18 = vld [vmem:[%s151_s2] sm:$0xff]  ;;  %v60_v22 = vld [vmem:[%s151_s2 + $0x8] sm:$0xff] }
   0x6   :  { %35 = vperm.xlu0 %71, %v24_v2  }
   0x8   :  { %v45_v12 = vld [vmem:[%s149_s3] sm:$0xff]  ;;  %v46_v15 = vld [vmem:[%s149_s3 + $0x8] sm:$0xff] }
  0x7d   :  { %v33_v7 = vpop.permute.xlu0 %32 }
  0x7e   :  { %vm37_vm1 = vcmp.eq.s32.totalorder %v30_v5, %v33_v7 }
  0x7f   :  { %v39_v8 = vsel %vm37_vm1, %v21_v6, 0.0 }
  0x80   :  { %41 = vadd.xlane.f32.xlu1 %v39_v8 }
  0x81   :  { %v36_v10 = vpop.permute.xlu0 %35 }
  0x82   :  { %vm38_vm2 = vcmp.eq.s32.totalorder %v30_v5, %v36_v10 }
  0x83   :  { %v40_v11 = vsel %vm38_vm2, %v22_v9, 0.0 }
  0x84   :  { %43 = vadd.xlane.f32.xlu1 %v40_v11 }
 0x109   :  { %v42_v13 = vpop.xlane.xlu1 %41 }
 0x10a   :  { %v47_v14 = vadd.f32 %v45_v12, %v42_v13 }
 0x10c   :  { %50 = vst.msk [vmem:[%s149_s3] sm:$0xff] %vm18_vm0, %v47_v14 }
 0x10d   :  { %v44_v16 = vpop.xlane.xlu1 %43 }
 0x10e   :  { %v48_v17 = vadd.f32 %v46_v15, %v44_v16 }
 0x110   :  { %51 = vst.msk [vmem:[%s149_s3 + $0x8] sm:$0xff] %vm18_vm0, %v48_v17 }
 0x113   :  { %v55_v19 = vld [vmem:[%s149_s3] sm:$0xff] }
 0x114   :  { %v57_v20 = vsub.f32 0.0, %v55_v19 }
 0x116   :  { %v61_v21 = vmul.f32 %v59_v18, %v57_v20 }
 0x117   :  { %v56_v23 = vld [vmem:[%s149_s3 + $0x8] sm:$0xff] }
 0x118   :  { %63 = vst.msk [vmem:[%s149_s3] sm:$0xff] %vm18_vm0, %v61_v21  ;;  %v58_v24 = vsub.f32 0.0, %v56_v23 }
 0x11a   :  { %v62_v25 = vmul.f32 %v60_v22, %v58_v24 }
 0x11c   :  { %64 = vst.msk [vmem:[%s149_s3 + $0x8] sm:$0xff] %vm18_vm0, %v62_v25 }

</bundles_post_ra>
